<compile_context>
chip_gen: v6e
topology: v6e:2x2x1
jax: 0.10.0
libtpu: 0.0.40
codegen_flags: <defaults>
</compile_context>

<pallas_src>
import functools

import jax
import jax.numpy as jnp
from jax.experimental import pallas as pl
from jax.experimental.pallas import tpu as pltpu


def _logreg_kernel(x_ref, w_ref, b_ref, o_ref):
    # x_ref: (TM, D) VMEM, w_ref: (1, D) VMEM, b_ref: (1, 1) SMEM, o_ref: (TM, 1) VMEM
    x = x_ref[...].astype(jnp.float32)
    w = w_ref[...].astype(jnp.float32)                 # lane-dense (1, D) weight
    # Broadcast-multiply (VPU) + cross-lane reduce (XLU): avoids a lane-width-1
    # MXU matmul that would use <1% of the systolic array.
    z = jnp.sum(x * w, axis=-1, keepdims=True)         # (TM, 1), f32 accumulate
    z = z + b_ref[0, 0]
    # exp lands on the EUP slot; the divide is hidden under the x DMA (mem-bound).
    o_ref[...] = (1.0 / (1.0 + jnp.exp(-z))).astype(o_ref.dtype)


def _choose_tile_m(batch, d, itemsize, per_buffer_budget_bytes=8 * 1024 * 1024):
    """Largest multiple-of-8 batch tile whose (TM, D) x-block fits one pipeline buffer.

    8 MiB/buffer -> 16 MiB double-buffered for x, comfortably inside the scoped
    VMEM limit on every generation (incl. v7x's 64 MiB physical VMEM).
    """
    tm = per_buffer_budget_bytes // max(1, d * itemsize)
    tm = max(8, (tm // 8) * 8)
    tm = min(tm, 2048)            # amortize ~0.35 us/grid-step without oversizing DMAs
    return min(tm, batch)         # tiny batches: block == full array extent


@functools.partial(jax.jit, static_argnames=("tile_m",))
def logistic_regression(x, weight, bias, *, tile_m=None):
    """x: (B, D), weight: (1, D), bias: (1,)  ->  sigmoid(x @ W^T + b), shape (B, 1)."""
    B, D = x.shape
    itemsize = jnp.dtype(x.dtype).itemsize
    tm = tile_m if tile_m is not None else _choose_tile_m(B, D, itemsize)
    grid = (pl.cdiv(B, tm),)

    b2 = bias.reshape(1, 1).astype(jnp.float32)        # scalar in SMEM

    cost = pl.CostEstimate(
        flops=2 * B * D,
        transcendentals=B,
        bytes_accessed=B * D * itemsize + D * itemsize + 4 * B + 4,
    )

    # TODO(synk): for very large input_size, add a second ("arbitrary") grid axis
    # over D with an f32 accumulator scratch so the tile fits v7x's 64 MiB VMEM
    # without shrinking TM.
    return pl.pallas_call(
        _logreg_kernel,
        out_shape=jax.ShapeDtypeStruct((B, 1), jnp.float32),
        grid_spec=pltpu.PrefetchScalarGridSpec(
            num_scalar_prefetch=0,
            grid=grid,
            in_specs=[
                # x: batch-tiled, auto double-buffered by the pipeline.
                pl.BlockSpec((tm, D), lambda i: (i, 0)),
                # weight: same block every step -> stays resident in VMEM.
                pl.BlockSpec((1, D), lambda i: (0, 0)),
                # bias: scalar in SMEM.
                pl.BlockSpec((1, 1), lambda i: (0, 0),
                             memory_space=pltpu.MemorySpace.SMEM),
            ],
            out_specs=pl.BlockSpec((tm, 1), lambda i: (i, 0)),
        ),
        compiler_params=pltpu.CompilerParams(
            dimension_semantics=("parallel",),   # v7x: shard batch tiles across 2 TCs
            vmem_limit_bytes=32 * 1024 * 1024,
        ),
        cost_estimate=cost,
    )(x, weight, b2)


if __name__ == "__main__":
    key = jax.random.PRNGKey(0)
    k_x, k_w, k_b = jax.random.split(key, 3)

    batch, input_size = 8, 32

    # Deterministic parameter init (mimic nn.Linear uniform(-1/sqrt(D), 1/sqrt(D)))
    bound = 1.0 / (input_size ** 0.5)
    weight = jax.random.uniform(k_w, (1, input_size), jnp.float32, -bound, bound)
    bias = jax.random.uniform(k_b, (1,), jnp.float32, -bound, bound)

    x = jax.random.normal(k_x, (batch, input_size), jnp.float32)

    out = logistic_regression(x, weight, bias)
    out = jax.block_until_ready(out)

    # Reference check in plain JAX
    ref = 1.0 / (1.0 + jnp.exp(-(x @ weight.T + bias)))
    assert out.shape == (batch, 1)
    assert jnp.allclose(out, ref, atol=1e-5, rtol=1e-5), float(jnp.max(jnp.abs(out - ref)))

    print("KERNEL_OK")
</pallas_src>

<mosaic_0001>
module attributes {stable_mosaic.version = 11 : i64} {
  func.func @_logreg_kernel(%arg0: i32, %arg1: memref<8x32xf32, #tpu.memory_space<vmem>>, %arg2: memref<1x32xf32, #tpu.memory_space<vmem>>, %arg3: memref<1x1xf32, #tpu.memory_space<smem>>, %arg4: memref<8x1xf32, #tpu.memory_space<vmem>>) attributes {dimension_semantics = [#tpu.dimension_semantics<parallel>], iteration_bounds = array<i64: 1>, scalar_prefetch = 0 : i64, scratch_operands = 0 : i64, tpu.core_type = #tpu.core_type<tc>, window_params = [{transform_indices = @transform_0, window_bounds = array<i64: 8, 32>}, {pipeline_mode = #tpu.pipeline_mode<synchronous>, transform_indices = @transform_1, window_bounds = array<i64: 1, 32>}, {transform_indices = @transform_2, window_bounds = array<i64: 1, 1>}, {transform_indices = @transform_3, window_bounds = array<i64: 8, 1>}]} {
    %c0 = arith.constant 0 : index
    %c0_0 = arith.constant 0 : index
    %0 = vector.load %arg1[%c0, %c0_0] : memref<8x32xf32, #tpu.memory_space<vmem>>, vector<8x32xf32>
    %c0_1 = arith.constant 0 : index
    %c0_2 = arith.constant 0 : index
    %1 = vector.load %arg2[%c0_1, %c0_2] : memref<1x32xf32, #tpu.memory_space<vmem>>, vector<1x32xf32>
    %2 = vector.broadcast %1 : vector<1x32xf32> to vector<8x32xf32>
    %3 = arith.mulf %0, %2 : vector<8x32xf32>
    %cst = arith.constant dense<0.000000e+00> : vector<8xf32>
    %4 = vector.multi_reduction <add>, %3, %cst [1] : vector<8x32xf32> to vector<8xf32>
    %5 = vector.shape_cast %4 : vector<8xf32> to vector<8x1xf32>
    %c0_3 = arith.constant 0 : index
    %c0_4 = arith.constant 0 : index
    %6 = memref.load %arg3[%c0_3, %c0_4] : memref<1x1xf32, #tpu.memory_space<smem>>
    %7 = vector.broadcast %6 : f32 to vector<8x1xf32>
    %8 = arith.addf %5, %7 : vector<8x1xf32>
    %cst_5 = arith.constant 0.000000e+00 : f32
    %9 = vector.broadcast %cst_5 : f32 to vector<8x1xf32>
    %10 = arith.subf %9, %8 : vector<8x1xf32>
    %11 = math.exp %10 : vector<8x1xf32>
    %cst_6 = arith.constant 1.000000e+00 : f32
    %12 = vector.broadcast %cst_6 : f32 to vector<8x1xf32>
    %13 = arith.addf %12, %11 : vector<8x1xf32>
    %cst_7 = arith.constant 1.000000e+00 : f32
    %14 = vector.broadcast %cst_7 : f32 to vector<8x1xf32>
    %15 = arith.divf %14, %13 : vector<8x1xf32>
    %c0_8 = arith.constant 0 : index
    %c0_9 = arith.constant 0 : index
    %16 = vector.load %arg4[%c0_8, %c0_9] : memref<8x1xf32, #tpu.memory_space<vmem>>, vector<8x1xf32>
    tpu.vector_store %arg4[%c0_8, %c0_9], %15 {strides = array<i32>} : memref<8x1xf32, #tpu.memory_space<vmem>>, vector<8x1xf32>,
    return
  }
  func.func @transform_0(%arg0: i32) -> (i32, i32) {
    %c0_i32 = arith.constant 0 : i32
    %c0_i32_0 = arith.constant 0 : i32
    return %arg0, %c0_i32 : i32, i32
  }
  func.func @transform_1(%arg0: i32) -> (i32, i32) {
    %c0_i32 = arith.constant 0 : i32
    %c0_i32_0 = arith.constant 0 : i32
    %c0_i32_1 = arith.constant 0 : i32
    return %c0_i32, %c0_i32_0 : i32, i32
  }
  func.func @transform_2(%arg0: i32) -> (i32, i32) {
    %c0_i32 = arith.constant 0 : i32
    %c0_i32_0 = arith.constant 0 : i32
    %c0_i32_1 = arith.constant 0 : i32
    return %c0_i32, %c0_i32_0 : i32, i32
  }
  func.func @transform_3(%arg0: i32) -> (i32, i32) {
    %c0_i32 = arith.constant 0 : i32
    %c0_i32_0 = arith.constant 0 : i32
    return %arg0, %c0_i32 : i32, i32
  }
}

</mosaic_0001>

<bundles_post_ra>
// kernel: logistic_regression.1
= control target key start
LH: loop header
LB: loop body
LE: loop exit
PB: predicated region body
PF: predicated region fallthrough
CT: control target
= control target key end

     0   :  { %9 = vsyncpa [#allocation4], 0  ;;  %s84_s12 = smov [#allocation3]   ;;  %s117_s0 = inlined_call_operand.hbm [shape: f32[8,32], index: 0, kind: input, shape index: {}]   ;;  %s118_s1 = inlined_call_operand.vmem [shape: f32[1,32], index: 1, kind: input, shape index: {}]   ;;  %s119_s2 = inlined_call_operand.<no memory space> [shape: f32[1,1], index: 2, kind: input, shape index: {}]   ;;  %s120_s3 = inlined_call_operand.vmem [shape: f32[8,1], index: 3, kind: output, shape index: {}]  }
   0x1   :  { %s16_s13 = sshll.u32 %s84_s12, 4  ;;  %s17_s13 = int_to_ptr.vmem [resolvable:$true] %s16_s13 }
   0x2   :  { %s70_s14 = scalar_lea.vmem %s17_s13, 128  ;;  %p75_p1 = scmp.lt.s32.totalorder %s17_s13, %s17_s13 }
   0x3   :  { %p71_p0 = scmp.ne.s32.totalorder %s17_s13, %s70_s14  ;;  %p76_p2 = scmp.lt.s32.totalorder %s70_s14, %s70_s14 }
   0x5   :  { %p77_p3 = por %p76_p2, %p75_p1 }
   0x7   :  { %p78_p4 = pnand %p77_p3, %p71_p0 }
   0x9   :  { %81 = shalt.err (!%p78_p4)
}
   0xa   :  { %19 = dma.hbm_to_vmem [thread:$0]  %s117_s0, 128, %s17_s13, [#allocation4]  }
   0xb   :  { %82 = dma.done.wait [#allocation4], 128  }
   0xc   :  { %83 = vsyncadd [#allocation4], 4294967168  ;;  %v27_v0 = vld [vmem:[#allocation3] sm:$0xff]  ;;  %vm36_vm0 = vcmask 261120   ;;  %v41_v4 = vstv %s119_s2  ;;  %vm49_vm1 = vcmask 7168  }
   0xd   :  { %v56_v1 = vld [vmem:[%s118_s1] ss:$0 sm:$0xff] }
   0xe   :  { %v35_v2 = vmul.f32 %v56_v1, %v27_v0 }
  0x10   :  { %v37_v3 = vsel %vm36_vm0, %v35_v2, 0.0 }
  0x11   :  { %38 = vadd.xlane.f32.xlu0 %v37_v3 }
  0x9a   :  { %v39_v5 = vpop.xlane.xlu0 %38 }
  0x9b   :  { %v42_v6 = vadd.f32 %v41_v4, %v39_v5 }
  0x9d   :  { %v43_v7 = vsub.f32 0.0, %v42_v6 }
  0x9f   :  { %v44_v8 = vmul.f32 1.442695, %v43_v7 }
  0xa1   :  { %58 = vpow2.f32 %v44_v8 }
  0xae   :  { %v59_v9 = vpop.eup %58 }
  0xaf   :  { %v46_v10 = vadd.f32 1.0, %v59_v9 }
  0xb1   :  { %60 = vrcp.f32 %v46_v10 }
  0xbe   :  { %v61_v11 = vpop.eup %60 }
  0xbf   :  { %50 = vst.msk [vmem:[%s120_s3] sm:$0xff] %vm49_vm1, %v61_v11 }
  0xc0   :  { %55 = vsyncpa [#allocation4], 1 }

</bundles_post_ra>
